<compile_context>
chip_gen: v6e
topology: v6e:2x2x1
jax: 0.10.0
libtpu: 0.0.40
codegen_flags: <defaults>
</compile_context>

<pallas_src>
import jax
import jax.numpy as jnp
from jax.experimental import pallas as pl
from jax.experimental.pallas import tpu as pltpu


# ----------------------------- Pallas kernel --------------------------------

def decoder_kernel(
    emb_ref,       # [B, E]        embedded tokens (dropout = identity)
    hid_ref,       # [B, H]        previous decoder hidden state
    enc_ref,       # [B, S, E2]    encoder outputs, batch-major
    attn_wh_ref,   # [H, H]        attention weight, hidden part (transposed)
    attn_we_ref,   # [E2, H]       attention weight, encoder part (transposed)
    attn_b_ref,    # [1, H]        attention bias
    v_w_ref,       # [1, H]        Attention.v weight (row vector)
    w_ie_ref,      # [3, E, H]     GRU W_ih, embedded part, per gate (r,z,n)
    w_iw_ref,      # [3, E2, H]    GRU W_ih, weighted-context part, per gate
    w_hh_ref,      # [3, H, H]     GRU W_hh, per gate
    b_gru_ref,     # [4, H]        rows: b_r(=bir+bhr), b_z(=biz+bhz), b_in, b_hn
    fc_wh_ref,     # [H,  O_pad]   fc_out weight, hidden part (lane-padded)
    fc_ww_ref,     # [E2, O_pad]   fc_out weight, weighted part
    fc_we_ref,     # [E,  O_pad]   fc_out weight, embedded part
    fc_b_ref,      # [1,  O_pad]
    pred_ref,      # out: [B, O_pad]
    newh_ref,      # out: [B, H]
):
    f32 = jnp.float32
    emb = emb_ref[...]                 # [B, E]
    hid = hid_ref[...]                 # [B, H]
    enc = enc_ref[...]                 # [B, S, E2]
    B, S, E2 = enc.shape
    H = hid.shape[1]

    # ---------------- Attention ----------------
    # energy[b,s] = tanh(hid[b] @ Wh + enc[b,s] @ We + b_attn)
    # hidden half computed once per batch row (hoisted out of src_len);
    # encoder half is one 2-D (B*S, E2) @ (E2, H) MXU matmul.
    hid_proj = jnp.dot(hid, attn_wh_ref[...], preferred_element_type=f32)       # [B, H]
    enc_proj = jnp.dot(enc.reshape(B * S, E2), attn_we_ref[...],
                       preferred_element_type=f32).reshape(B, S, H)             # [B, S, H]
    energy = jnp.tanh(enc_proj + hid_proj[:, None, :] + attn_b_ref[...][None, :, :])
    scores = jnp.sum(energy * v_w_ref[...][None, :, :], axis=2)                 # [B, S]

    # softmax over src_len (lane axis)
    scores = scores - jnp.max(scores, axis=1, keepdims=True)
    es = jnp.exp(scores)
    a = es / jnp.sum(es, axis=1, keepdims=True)                                 # [B, S]

    # attention-weighted context: VPU multiply + sublane reduce over S
    weighted = jnp.sum(a[:, :, None] * enc, axis=1)                             # [B, E2]

    # ---------------- GRU cell (single step, single layer) ----------------
    # Per-gate, split-input matmuls: no lane-axis concat, no 3H-wide slices.
    def ih(g):
        return (jnp.dot(emb, w_ie_ref[g], preferred_element_type=f32)
                + jnp.dot(weighted, w_iw_ref[g], preferred_element_type=f32))

    def hh(g):
        return jnp.dot(hid, w_hh_ref[g], preferred_element_type=f32)

    bg = b_gru_ref[...]                                                          # [4, H]
    r = jax.nn.sigmoid(ih(0) + hh(0) + bg[0:1, :])
    z = jax.nn.sigmoid(ih(1) + hh(1) + bg[1:2, :])
    n = jnp.tanh(ih(2) + bg[2:3, :] + r * (hh(2) + bg[3:4, :]))
    h_new = (1.0 - z) * n + z * hid                                              # [B, H]
    # (output == hidden) holds trivially for a 1-layer, 1-step GRU.

    # ---------------- Output projection (lane-dense, padded O) ----------------
    pred = (jnp.dot(h_new, fc_wh_ref[...], preferred_element_type=f32)
            + jnp.dot(weighted, fc_ww_ref[...], preferred_element_type=f32)
            + jnp.dot(emb, fc_we_ref[...], preferred_element_type=f32)
            + fc_b_ref[...])                                                     # [B, O_pad]

    pred_ref[...] = pred
    newh_ref[...] = h_new


# ----------------------------- parameter prep (once per model) ---------------

def prepare_params(raw):
    """Transpose / split / pad PyTorch-layout weights for the kernel.

    Done ONCE per model (outside the per-step call path)."""
    E = raw["embedding"].shape[1]
    H = raw["gru_w_hh"].shape[1]
    E2 = raw["attn_weight"].shape[1] - H
    O = raw["fc_weight"].shape[0]
    O_pad = ((O + 127) // 128) * 128

    attn_w_T = raw["attn_weight"].T            # [H+E2, H]  (cat order: hidden, enc)
    w_ih_T = raw["gru_w_ih"].T                 # [E+E2, 3H] (cat order: emb, weighted)
    w_hh_T = raw["gru_w_hh"].T                 # [H, 3H]
    fc_w_T = raw["fc_weight"].T                # [H+E2+E, O] (cat: h_new, weighted, emb)

    def gate_stack(w):                         # [in, 3H] -> [3, in, H]  (r, z, n)
        return jnp.stack([w[:, 0:H], w[:, H:2 * H], w[:, 2 * H:3 * H]], axis=0)

    b_ih, b_hh = raw["gru_b_ih"], raw["gru_b_hh"]
    b_gru = jnp.stack([b_ih[0:H] + b_hh[0:H],          # r
                       b_ih[H:2 * H] + b_hh[H:2 * H],  # z
                       b_ih[2 * H:3 * H],              # n (input side)
                       b_hh[2 * H:3 * H]], axis=0)     # n (hidden side)

    def pad_lanes(w):                          # zero-pad last dim O -> O_pad
        return jnp.pad(w, ((0, 0), (0, O_pad - O)))

    return {
        "embedding": raw["embedding"],                      # [O, E]
        "attn_w_h": attn_w_T[:H],                           # [H, H]
        "attn_w_e": attn_w_T[H:],                           # [E2, H]
        "attn_b": raw["attn_bias"][None, :],                # [1, H]
        "v_w": raw["v_weight"],                             # [1, H]
        "w_ie": gate_stack(w_ih_T[:E]),                     # [3, E, H]
        "w_iw": gate_stack(w_ih_T[E:]),                     # [3, E2, H]
        "w_hh": gate_stack(w_hh_T),                         # [3, H, H]
        "b_gru": b_gru,                                     # [4, H]
        "fc_w_h": pad_lanes(fc_w_T[:H]),                    # [H, O_pad]
        "fc_w_w": pad_lanes(fc_w_T[H:H + E2]),              # [E2, O_pad]
        "fc_w_e": pad_lanes(fc_w_T[H + E2:]),               # [E, O_pad]
        "fc_b": pad_lanes(raw["fc_bias"][None, :]),         # [1, O_pad]
    }


def prepare_encoder_outputs(encoder_outputs):
    """[S, B, 2*enc_hid] -> [B, S, 2*enc_hid]; do ONCE per source sequence
    before the decode loop (not per decode step)."""
    return jnp.transpose(encoder_outputs, (1, 0, 2))


# ----------------------------- per-step forward ------------------------------

@jax.jit
def decoder_forward(input_ids, hidden, enc_bse, prep):
    """
    input_ids: [B]            int32 token ids
    hidden:    [B, H]         previous decoder hidden state
    enc_bse:   [B, S, 2*Eh]   encoder outputs, batch-major (pre-transposed once)
    prep:      dict from prepare_params()
    returns (prediction [B, O], new_hidden [B, H])
    """
    embedded = jnp.take(prep["embedding"], input_ids, axis=0)       # [B, E]
    B, H = hidden.shape
    O = prep["embedding"].shape[0]
    O_pad = prep["fc_b"].shape[1]

    vmem = pl.BlockSpec(memory_space=pltpu.MemorySpace.VMEM)
    args = (embedded, hidden, enc_bse,
            prep["attn_w_h"], prep["attn_w_e"], prep["attn_b"], prep["v_w"],
            prep["w_ie"], prep["w_iw"], prep["w_hh"], prep["b_gru"],
            prep["fc_w_h"], prep["fc_w_w"], prep["fc_w_e"], prep["fc_b"])

    pred_pad, new_hidden = pl.pallas_call(
        decoder_kernel,
        out_shape=(
            jax.ShapeDtypeStruct((B, O_pad), jnp.float32),
            jax.ShapeDtypeStruct((B, H), jnp.float32),
        ),
        in_specs=[vmem] * len(args),
        out_specs=(vmem, vmem),
        # Recurrent state stays in place: alias hidden (input 1) -> new_hidden
        # (output 1) so the decode loop does not round-trip a fresh HBM buffer.
        input_output_aliases={1: 1},
    )(*args)

    return pred_pad[:, :O], new_hidden


# ----------------------------- reference (pure JAX, PyTorch layout) ----------

def decoder_reference(input_ids, hidden, encoder_outputs, raw):
    embedded = jnp.take(raw["embedding"], input_ids, axis=0)
    enc = jnp.transpose(encoder_outputs, (1, 0, 2))       # [B, S, E2]
    B, S, _ = enc.shape
    H = hidden.shape[1]

    hid_rep = jnp.broadcast_to(hidden[:, None, :], (B, S, H))
    cat = jnp.concatenate([hid_rep, enc], axis=2)
    energy = jnp.tanh(cat @ raw["attn_weight"].T + raw["attn_bias"])
    scores = jnp.squeeze(energy @ raw["v_weight"].T, -1)
    a = jax.nn.softmax(scores, axis=1)
    weighted = jnp.einsum("bs,bse->be", a, enc)

    x = jnp.concatenate([embedded, weighted], axis=1)
    gi = x @ raw["gru_w_ih"].T + raw["gru_b_ih"]
    gh = hidden @ raw["gru_w_hh"].T + raw["gru_b_hh"]
    r = jax.nn.sigmoid(gi[:, :H] + gh[:, :H])
    z = jax.nn.sigmoid(gi[:, H:2 * H] + gh[:, H:2 * H])
    n = jnp.tanh(gi[:, 2 * H:] + r * gh[:, 2 * H:])
    h_new = (1 - z) * n + z * hidden

    pred = (jnp.concatenate([h_new, weighted, embedded], axis=1)
            @ raw["fc_weight"].T + raw["fc_bias"])
    return pred, h_new


# ----------------------------- main -------------------------------------------

if __name__ == "__main__":
    OUTPUT_DIM = 24   # vocab size
    EMB_DIM = 32
    ENC_HID = 16      # encoder hidden (bidirectional -> 2*ENC_HID features)
    DEC_HID = 32
    SRC_LEN = 8
    BATCH = 2

    key = jax.random.PRNGKey(0)
    ks = jax.random.split(key, 16)

    def init(k, shape, scale=0.1):
        return (scale * jax.random.normal(k, shape)).astype(jnp.float32)

    enc2 = 2 * ENC_HID
    # Parameters in PyTorch layout (Linear: [out, in]; GRU: [3H, in], gate order r,z,n).
    raw_params = {
        "embedding": init(ks[0], (OUTPUT_DIM, EMB_DIM)),
        "attn_weight": init(ks[1], (DEC_HID, DEC_HID + enc2)),
        "attn_bias": init(ks[2], (DEC_HID,)),
        "v_weight": init(ks[3], (1, DEC_HID)),
        "gru_w_ih": init(ks[4], (3 * DEC_HID, EMB_DIM + enc2)),
        "gru_w_hh": init(ks[5], (3 * DEC_HID, DEC_HID)),
        "gru_b_ih": init(ks[6], (3 * DEC_HID,)),
        "gru_b_hh": init(ks[7], (3 * DEC_HID,)),
        "fc_weight": init(ks[8], (OUTPUT_DIM, DEC_HID + enc2 + EMB_DIM)),
        "fc_bias": init(ks[9], (OUTPUT_DIM,)),
    }

    input_ids = jax.random.randint(ks[10], (BATCH,), 0, OUTPUT_DIM, dtype=jnp.int32)
    hidden = init(ks[11], (BATCH, DEC_HID), scale=1.0)
    encoder_outputs = init(ks[12], (SRC_LEN, BATCH, enc2), scale=1.0)   # PyTorch layout

    # One-time prep (per model / per source sequence), hoisted out of the step path.
    prep = prepare_params(raw_params)
    enc_bse = prepare_encoder_outputs(encoder_outputs)

    pred, new_h = decoder_forward(input_ids, hidden, enc_bse, prep)
    jax.block_until_ready((pred, new_h))

    pred_ref, new_h_ref = decoder_reference(input_ids, hidden, encoder_outputs, raw_params)
    assert pred.shape == (BATCH, OUTPUT_DIM) and new_h.shape == (BATCH, DEC_HID)
    assert jnp.allclose(pred, pred_ref, atol=1e-4, rtol=1e-4)
    assert jnp.allclose(new_h, new_h_ref, atol=1e-4, rtol=1e-4)

    print("KERNEL_OK")
</pallas_src>

<mosaic_0001>
module attributes {stable_mosaic.version = 11 : i64} {
  func.func @decoder_kernel(%arg0: memref<2x32xf32, #tpu.memory_space<vmem>>, %arg1: memref<2x32xf32, #tpu.memory_space<vmem>>, %arg2: memref<2x8x32xf32, #tpu.memory_space<vmem>>, %arg3: memref<32x32xf32, #tpu.memory_space<vmem>>, %arg4: memref<32x32xf32, #tpu.memory_space<vmem>>, %arg5: memref<1x32xf32, #tpu.memory_space<vmem>>, %arg6: memref<1x32xf32, #tpu.memory_space<vmem>>, %arg7: memref<3x32x32xf32, #tpu.memory_space<vmem>>, %arg8: memref<3x32x32xf32, #tpu.memory_space<vmem>>, %arg9: memref<3x32x32xf32, #tpu.memory_space<vmem>>, %arg10: memref<4x32xf32, #tpu.memory_space<vmem>>, %arg11: memref<32x128xf32, #tpu.memory_space<vmem>>, %arg12: memref<32x128xf32, #tpu.memory_space<vmem>>, %arg13: memref<32x128xf32, #tpu.memory_space<vmem>>, %arg14: memref<1x128xf32, #tpu.memory_space<vmem>>, %arg15: memref<2x128xf32, #tpu.memory_space<vmem>>, %arg16: memref<2x32xf32, #tpu.memory_space<vmem>>) attributes {dimension_semantics = [], scalar_prefetch = 0 : i64, scratch_operands = 0 : i64, tpu.core_type = #tpu.core_type<tc>} {
    %c0 = arith.constant 0 : index
    %c0_0 = arith.constant 0 : index
    %0 = vector.load %arg0[%c0, %c0_0] : memref<2x32xf32, #tpu.memory_space<vmem>>, vector<2x32xf32>
    %c0_1 = arith.constant 0 : index
    %c0_2 = arith.constant 0 : index
    %1 = vector.load %arg1[%c0_1, %c0_2] : memref<2x32xf32, #tpu.memory_space<vmem>>, vector<2x32xf32>
    %c0_3 = arith.constant 0 : index
    %c0_4 = arith.constant 0 : index
    %c0_5 = arith.constant 0 : index
    %2 = vector.load %arg2[%c0_3, %c0_4, %c0_5] : memref<2x8x32xf32, #tpu.memory_space<vmem>>, vector<2x8x32xf32>
    %c0_6 = arith.constant 0 : index
    %c0_7 = arith.constant 0 : index
    %3 = vector.load %arg3[%c0_6, %c0_7] : memref<32x32xf32, #tpu.memory_space<vmem>>, vector<32x32xf32>
    %cst = arith.constant dense<0.000000e+00> : vector<2x32xf32>
    %4 = tpu.matmul %1, %3, %cst {dimension_numbers = #tpu.dot_dimension_numbers<[1], [0], [0], [1], [0, 0, 1, 1], [], []>} : vector<2x32xf32>, vector<32x32xf32>, vector<2x32xf32> -> vector<2x32xf32>
    %5 = vector.shape_cast %2 : vector<2x8x32xf32> to vector<16x32xf32>
    %c0_8 = arith.constant 0 : index
    %c0_9 = arith.constant 0 : index
    %6 = vector.load %arg4[%c0_8, %c0_9] : memref<32x32xf32, #tpu.memory_space<vmem>>, vector<32x32xf32>
    %cst_10 = arith.constant dense<0.000000e+00> : vector<16x32xf32>
    %7 = tpu.matmul %5, %6, %cst_10 {dimension_numbers = #tpu.dot_dimension_numbers<[1], [0], [0], [1], [0, 0, 1, 1], [], []>} : vector<16x32xf32>, vector<32x32xf32>, vector<16x32xf32> -> vector<16x32xf32>
    %8 = vector.shape_cast %7 : vector<16x32xf32> to vector<2x8x32xf32>
    %9 = vector.shape_cast %4 : vector<2x32xf32> to vector<2x1x32xf32>
    %10 = vector.broadcast %9 : vector<2x1x32xf32> to vector<2x8x32xf32>
    %11 = arith.addf %8, %10 : vector<2x8x32xf32>
    %c0_11 = arith.constant 0 : index
    %c0_12 = arith.constant 0 : index
    %12 = vector.load %arg5[%c0_11, %c0_12] : memref<1x32xf32, #tpu.memory_space<vmem>>, vector<1x32xf32>
    %13 = vector.shape_cast %12 : vector<1x32xf32> to vector<1x1x32xf32>
    %14 = vector.broadcast %13 : vector<1x1x32xf32> to vector<2x8x32xf32>
    %15 = arith.addf %11, %14 : vector<2x8x32xf32>
    %16 = math.tanh %15 : vector<2x8x32xf32>
    %c0_13 = arith.constant 0 : index
    %c0_14 = arith.constant 0 : index
    %17 = vector.load %arg6[%c0_13, %c0_14] : memref<1x32xf32, #tpu.memory_space<vmem>>, vector<1x32xf32>
    %18 = vector.shape_cast %17 : vector<1x32xf32> to vector<1x1x32xf32>
    %19 = vector.broadcast %18 : vector<1x1x32xf32> to vector<2x8x32xf32>
    %20 = arith.mulf %16, %19 : vector<2x8x32xf32>
    %cst_15 = arith.constant dense<0.000000e+00> : vector<2x8xf32>
    %21 = vector.multi_reduction <add>, %20, %cst_15 [2] : vector<2x8x32xf32> to vector<2x8xf32>
    %cst_16 = arith.constant dense<0xFF800000> : vector<2xf32>
    %22 = vector.multi_reduction <maximumf>, %21, %cst_16 [1] : vector<2x8xf32> to vector<2xf32>
    %23 = vector.shape_cast %22 : vector<2xf32> to vector<2x1xf32>
    %24 = vector.broadcast %23 : vector<2x1xf32> to vector<2x8xf32>
    %25 = arith.subf %21, %24 : vector<2x8xf32>
    %26 = math.exp %25 : vector<2x8xf32>
    %cst_17 = arith.constant dense<0.000000e+00> : vector<2xf32>
    %27 = vector.multi_reduction <add>, %26, %cst_17 [1] : vector<2x8xf32> to vector<2xf32>
    %28 = vector.shape_cast %27 : vector<2xf32> to vector<2x1xf32>
    %29 = vector.broadcast %28 : vector<2x1xf32> to vector<2x8xf32>
    %30 = arith.divf %26, %29 : vector<2x8xf32>
    %31 = vector.shape_cast %30 : vector<2x8xf32> to vector<2x8x1xf32>
    %32 = vector.broadcast %31 : vector<2x8x1xf32> to vector<2x8x32xf32>
    %33 = arith.mulf %32, %2 : vector<2x8x32xf32>
    %cst_18 = arith.constant dense<0.000000e+00> : vector<2x32xf32>
    %34 = vector.multi_reduction <add>, %33, %cst_18 [1] : vector<2x8x32xf32> to vector<2x32xf32>
    %c0_19 = arith.constant 0 : index
    %c0_20 = arith.constant 0 : index
    %35 = vector.load %arg10[%c0_19, %c0_20] : memref<4x32xf32, #tpu.memory_space<vmem>>, vector<4x32xf32>
    %c0_21 = arith.constant 0 : index
    %c0_22 = arith.constant 0 : index
    %c0_23 = arith.constant 0 : index
    %36 = vector.load %arg7[%c0_21, %c0_22, %c0_23] : memref<3x32x32xf32, #tpu.memory_space<vmem>>, vector<1x32x32xf32>
    %37 = vector.shape_cast %36 : vector<1x32x32xf32> to vector<32x32xf32>
    %cst_24 = arith.constant dense<0.000000e+00> : vector<2x32xf32>
    %38 = tpu.matmul %0, %37, %cst_24 {dimension_numbers = #tpu.dot_dimension_numbers<[1], [0], [0], [1], [0, 0, 1, 1], [], []>} : vector<2x32xf32>, vector<32x32xf32>, vector<2x32xf32> -> vector<2x32xf32>
    %c0_25 = arith.constant 0 : index
    %c0_26 = arith.constant 0 : index
    %c0_27 = arith.constant 0 : index
    %39 = vector.load %arg8[%c0_25, %c0_26, %c0_27] : memref<3x32x32xf32, #tpu.memory_space<vmem>>, vector<1x32x32xf32>
    %40 = vector.shape_cast %39 : vector<1x32x32xf32> to vector<32x32xf32>
    %cst_28 = arith.constant dense<0.000000e+00> : vector<2x32xf32>
    %41 = tpu.matmul %34, %40, %cst_28 {dimension_numbers = #tpu.dot_dimension_numbers<[1], [0], [0], [1], [0, 0, 1, 1], [], []>} : vector<2x32xf32>, vector<32x32xf32>, vector<2x32xf32> -> vector<2x32xf32>
    %42 = arith.addf %38, %41 : vector<2x32xf32>
    %c0_29 = arith.constant 0 : index
    %c0_30 = arith.constant 0 : index
    %c0_31 = arith.constant 0 : index
    %43 = vector.load %arg9[%c0_29, %c0_30, %c0_31] : memref<3x32x32xf32, #tpu.memory_space<vmem>>, vector<1x32x32xf32>
    %44 = vector.shape_cast %43 : vector<1x32x32xf32> to vector<32x32xf32>
    %cst_32 = arith.constant dense<0.000000e+00> : vector<2x32xf32>
    %45 = tpu.matmul %1, %44, %cst_32 {dimension_numbers = #tpu.dot_dimension_numbers<[1], [0], [0], [1], [0, 0, 1, 1], [], []>} : vector<2x32xf32>, vector<32x32xf32>, vector<2x32xf32> -> vector<2x32xf32>
    %46 = arith.addf %42, %45 : vector<2x32xf32>
    %47 = vector.extract_strided_slice %35 {offsets = [0, 0], sizes = [1, 32], strides = [1, 1]} : vector<4x32xf32> to vector<1x32xf32>
    %48 = vector.broadcast %47 : vector<1x32xf32> to vector<2x32xf32>
    %49 = arith.addf %46, %48 : vector<2x32xf32>
    %50 = arith.negf %49 : vector<2x32xf32>
    %51 = math.exp %50 : vector<2x32xf32>
    %cst_33 = arith.constant 1.000000e+00 : f32
    %52 = vector.broadcast %cst_33 : f32 to vector<2x32xf32>
    %53 = arith.addf %52, %51 : vector<2x32xf32>
    %54 = arith.divf %52, %53 : vector<2x32xf32>
    %c1 = arith.constant 1 : index
    %c0_34 = arith.constant 0 : index
    %c0_35 = arith.constant 0 : index
    %55 = vector.load %arg7[%c1, %c0_34, %c0_35] : memref<3x32x32xf32, #tpu.memory_space<vmem>>, vector<1x32x32xf32>
    %56 = vector.shape_cast %55 : vector<1x32x32xf32> to vector<32x32xf32>
    %cst_36 = arith.constant dense<0.000000e+00> : vector<2x32xf32>
    %57 = tpu.matmul %0, %56, %cst_36 {dimension_numbers = #tpu.dot_dimension_numbers<[1], [0], [0], [1], [0, 0, 1, 1], [], []>} : vector<2x32xf32>, vector<32x32xf32>, vector<2x32xf32> -> vector<2x32xf32>
    %c1_37 = arith.constant 1 : index
    %c0_38 = arith.constant 0 : index
    %c0_39 = arith.constant 0 : index
    %58 = vector.load %arg8[%c1_37, %c0_38, %c0_39] : memref<3x32x32xf32, #tpu.memory_space<vmem>>, vector<1x32x32xf32>
    %59 = vector.shape_cast %58 : vector<1x32x32xf32> to vector<32x32xf32>
    %cst_40 = arith.constant dense<0.000000e+00> : vector<2x32xf32>
    %60 = tpu.matmul %34, %59, %cst_40 {dimension_numbers = #tpu.dot_dimension_numbers<[1], [0], [0], [1], [0, 0, 1, 1], [], []>} : vector<2x32xf32>, vector<32x32xf32>, vector<2x32xf32> -> vector<2x32xf32>
    %61 = arith.addf %57, %60 : vector<2x32xf32>
    %c1_41 = arith.constant 1 : index
    %c0_42 = arith.constant 0 : index
    %c0_43 = arith.constant 0 : index
    %62 = vector.load %arg9[%c1_41, %c0_42, %c0_43] : memref<3x32x32xf32, #tpu.memory_space<vmem>>, vector<1x32x32xf32>
    %63 = vector.shape_cast %62 : vector<1x32x32xf32> to vector<32x32xf32>
    %cst_44 = arith.constant dense<0.000000e+00> : vector<2x32xf32>
    %64 = tpu.matmul %1, %63, %cst_44 {dimension_numbers = #tpu.dot_dimension_numbers<[1], [0], [0], [1], [0, 0, 1, 1], [], []>} : vector<2x32xf32>, vector<32x32xf32>, vector<2x32xf32> -> vector<2x32xf32>
    %65 = arith.addf %61, %64 : vector<2x32xf32>
    %66 = vector.extract_strided_slice %35 {offsets = [1, 0], sizes = [1, 32], strides = [1, 1]} : vector<4x32xf32> to vector<1x32xf32>
    %67 = vector.broadcast %66 : vector<1x32xf32> to vector<2x32xf32>
    %68 = arith.addf %65, %67 : vector<2x32xf32>
    %69 = arith.negf %68 : vector<2x32xf32>
    %70 = math.exp %69 : vector<2x32xf32>
    %cst_45 = arith.constant 1.000000e+00 : f32
    %71 = vector.broadcast %cst_45 : f32 to vector<2x32xf32>
    %72 = arith.addf %71, %70 : vector<2x32xf32>
    %73 = arith.divf %71, %72 : vector<2x32xf32>
    %c2 = arith.constant 2 : index
    %c0_46 = arith.constant 0 : index
    %c0_47 = arith.constant 0 : index
    %74 = vector.load %arg7[%c2, %c0_46, %c0_47] : memref<3x32x32xf32, #tpu.memory_space<vmem>>, vector<1x32x32xf32>
    %75 = vector.shape_cast %74 : vector<1x32x32xf32> to vector<32x32xf32>
    %cst_48 = arith.constant dense<0.000000e+00> : vector<2x32xf32>
    %76 = tpu.matmul %0, %75, %cst_48 {dimension_numbers = #tpu.dot_dimension_numbers<[1], [0], [0], [1], [0, 0, 1, 1], [], []>} : vector<2x32xf32>, vector<32x32xf32>, vector<2x32xf32> -> vector<2x32xf32>
    %c2_49 = arith.constant 2 : index
    %c0_50 = arith.constant 0 : index
    %c0_51 = arith.constant 0 : index
    %77 = vector.load %arg8[%c2_49, %c0_50, %c0_51] : memref<3x32x32xf32, #tpu.memory_space<vmem>>, vector<1x32x32xf32>
    %78 = vector.shape_cast %77 : vector<1x32x32xf32> to vector<32x32xf32>
    %cst_52 = arith.constant dense<0.000000e+00> : vector<2x32xf32>
    %79 = tpu.matmul %34, %78, %cst_52 {dimension_numbers = #tpu.dot_dimension_numbers<[1], [0], [0], [1], [0, 0, 1, 1], [], []>} : vector<2x32xf32>, vector<32x32xf32>, vector<2x32xf32> -> vector<2x32xf32>
    %80 = arith.addf %76, %79 : vector<2x32xf32>
    %81 = vector.extract_strided_slice %35 {offsets = [2, 0], sizes = [1, 32], strides = [1, 1]} : vector<4x32xf32> to vector<1x32xf32>
    %82 = vector.broadcast %81 : vector<1x32xf32> to vector<2x32xf32>
    %83 = arith.addf %80, %82 : vector<2x32xf32>
    %c2_53 = arith.constant 2 : index
    %c0_54 = arith.constant 0 : index
    %c0_55 = arith.constant 0 : index
    %84 = vector.load %arg9[%c2_53, %c0_54, %c0_55] : memref<3x32x32xf32, #tpu.memory_space<vmem>>, vector<1x32x32xf32>
    %85 = vector.shape_cast %84 : vector<1x32x32xf32> to vector<32x32xf32>
    %cst_56 = arith.constant dense<0.000000e+00> : vector<2x32xf32>
    %86 = tpu.matmul %1, %85, %cst_56 {dimension_numbers = #tpu.dot_dimension_numbers<[1], [0], [0], [1], [0, 0, 1, 1], [], []>} : vector<2x32xf32>, vector<32x32xf32>, vector<2x32xf32> -> vector<2x32xf32>
    %87 = vector.extract_strided_slice %35 {offsets = [3, 0], sizes = [1, 32], strides = [1, 1]} : vector<4x32xf32> to vector<1x32xf32>
    %88 = vector.broadcast %87 : vector<1x32xf32> to vector<2x32xf32>
    %89 = arith.addf %86, %88 : vector<2x32xf32>
    %90 = arith.mulf %54, %89 : vector<2x32xf32>
    %91 = arith.addf %83, %90 : vector<2x32xf32>
    %92 = math.tanh %91 : vector<2x32xf32>
    %cst_57 = arith.constant 1.000000e+00 : f32
    %93 = vector.broadcast %cst_57 : f32 to vector<2x32xf32>
    %94 = arith.subf %93, %73 : vector<2x32xf32>
    %95 = arith.mulf %94, %92 : vector<2x32xf32>
    %96 = arith.mulf %73, %1 : vector<2x32xf32>
    %97 = arith.addf %95, %96 : vector<2x32xf32>
    %c0_58 = arith.constant 0 : index
    %c0_59 = arith.constant 0 : index
    %98 = vector.load %arg11[%c0_58, %c0_59] : memref<32x128xf32, #tpu.memory_space<vmem>>, vector<32x128xf32>
    %cst_60 = arith.constant dense<0.000000e+00> : vector<2x128xf32>
    %99 = tpu.matmul %97, %98, %cst_60 {dimension_numbers = #tpu.dot_dimension_numbers<[1], [0], [0], [1], [0, 0, 1, 1], [], []>} : vector<2x32xf32>, vector<32x128xf32>, vector<2x128xf32> -> vector<2x128xf32>
    %c0_61 = arith.constant 0 : index
    %c0_62 = arith.constant 0 : index
    %100 = vector.load %arg12[%c0_61, %c0_62] : memref<32x128xf32, #tpu.memory_space<vmem>>, vector<32x128xf32>
    %cst_63 = arith.constant dense<0.000000e+00> : vector<2x128xf32>
    %101 = tpu.matmul %34, %100, %cst_63 {dimension_numbers = #tpu.dot_dimension_numbers<[1], [0], [0], [1], [0, 0, 1, 1], [], []>} : vector<2x32xf32>, vector<32x128xf32>, vector<2x128xf32> -> vector<2x128xf32>
    %102 = arith.addf %99, %101 : vector<2x128xf32>
    %c0_64 = arith.constant 0 : index
    %c0_65 = arith.constant 0 : index
    %103 = vector.load %arg13[%c0_64, %c0_65] : memref<32x128xf32, #tpu.memory_space<vmem>>, vector<32x128xf32>
    %cst_66 = arith.constant dense<0.000000e+00> : vector<2x128xf32>
    %104 = tpu.matmul %0, %103, %cst_66 {dimension_numbers = #tpu.dot_dimension_numbers<[1], [0], [0], [1], [0, 0, 1, 1], [], []>} : vector<2x32xf32>, vector<32x128xf32>, vector<2x128xf32> -> vector<2x128xf32>
    %105 = arith.addf %102, %104 : vector<2x128xf32>
    %c0_67 = arith.constant 0 : index
    %c0_68 = arith.constant 0 : index
    %106 = vector.load %arg14[%c0_67, %c0_68] : memref<1x128xf32, #tpu.memory_space<vmem>>, vector<1x128xf32>
    %107 = vector.broadcast %106 : vector<1x128xf32> to vector<2x128xf32>
    %108 = arith.addf %105, %107 : vector<2x128xf32>
    %c0_69 = arith.constant 0 : index
    %c0_70 = arith.constant 0 : index
    %109 = vector.load %arg15[%c0_69, %c0_70] : memref<2x128xf32, #tpu.memory_space<vmem>>, vector<2x128xf32>
    tpu.vector_store %arg15[%c0_69, %c0_70], %108 {strides = array<i32>} : memref<2x128xf32, #tpu.memory_space<vmem>>, vector<2x128xf32>,
    %c0_71 = arith.constant 0 : index
    %c0_72 = arith.constant 0 : index
    %110 = vector.load %arg16[%c0_71, %c0_72] : memref<2x32xf32, #tpu.memory_space<vmem>>, vector<2x32xf32>
    tpu.vector_store %arg16[%c0_71, %c0_72], %97 {strides = array<i32>} : memref<2x32xf32, #tpu.memory_space<vmem>>, vector<2x32xf32>,
    return
  }
}

</mosaic_0001>

<bundles_post_ra>
// kernel: decoder_forward.1
= control target key start
LH: loop header
LB: loop body
LE: loop exit
PB: predicated region body
PF: predicated region fallthrough
CT: control target
= control target key end

     0   :  { %s2239_s0 = inlined_call_operand.vmem [shape: f32[2,32], index: 0, kind: input, shape index: {}]   ;;  %s2240_s1 = inlined_call_operand.vmem [shape: f32[2,32], index: 1, kind: input, shape index: {}, may-alias: {1,16}]   ;;  %s2241_s2 = inlined_call_operand.vmem [shape: f32[2,8,32], index: 2, kind: input, shape index: {}]   ;;  %s2242_s3 = inlined_call_operand.vmem [shape: f32[32,32], index: 3, kind: input, shape index: {}]   ;;  %s2243_s4 = inlined_call_operand.hbm [shape: f32[32,32], index: 4, kind: input, shape index: {}]   ;;  %s2244_s5 = inlined_call_operand.vmem [shape: f32[1,32], index: 5, kind: input, shape index: {}]   ;;  %s2245_s6 = inlined_call_operand.vmem [shape: f32[1,32], index: 6, kind: input, shape index: {}]   ;;  %s2246_s7 = inlined_call_operand.hbm [shape: f32[3,32,32], index: 7, kind: input, shape index: {}]   ;;  %s2247_s8 = inlined_call_operand.hbm [shape: f32[3,32,32], index: 8, kind: input, shape index: {}]   ;;  %s2248_s9 = inlined_call_operand.hbm [shape: f32[3,32,32], index: 9, kind: input, shape index: {}]   ;;  %s2249_s10 = inlined_call_operand.vmem [shape: f32[4,32], index: 10, kind: input, shape index: {}]   ;;  %s2250_s11 = inlined_call_operand.hbm [shape: f32[32,128], index: 11, kind: input, shape index: {}]   ;;  %s2251_s12 = inlined_call_operand.hbm [shape: f32[32,128], index: 12, kind: input, shape index: {}]   ;;  %s2252_s13 = inlined_call_operand.hbm [shape: f32[32,128], index: 13, kind: input, shape index: {}]   ;;  %s2253_s14 = inlined_call_operand.vmem [shape: f32[1,128], index: 14, kind: input, shape index: {}]   ;;  %s2254_s15 = inlined_call_operand.hbm [shape: f32[2,128], index: 15, kind: output, shape index: {0}]   ;;  %s2255_s16 = inlined_call_operand.vmem [shape: f32[2,32], index: 16, kind: output, shape index: {1}, may-alias: {1,16}]  }
   0x1   :  { %2256 = sst [smem:[#allocation20_spill]] %s2239_s0 }
   0x2   :  { %22 = vsyncpa [#allocation3], 0 }
   0x3   :  { %23 = vsyncpa [#allocation6], 0 }
   0x4   :  { %24 = vsyncpa [#allocation9], 0 }
   0x5   :  { %25 = vsyncpa [#allocation12], 0 }
   0x6   :  { %26 = vsyncpa [#allocation4], 0  ;;  %s1907_s21 = smov [#allocation5]   ;;  %s1908_s23 = smov [#allocation8]  }
   0x7   :  { %s56_s22 = sshll.u32 %s1907_s21, 4  ;;  %s80_s24 = sshll.u32 %s1908_s23, 4  ;;  %s57_s22 = int_to_ptr.vmem [resolvable:$true] %s56_s22  ;;  %s81_s24 = int_to_ptr.vmem [resolvable:$true] %s80_s24 }
   0x8   :  { %s1745_s25 = scalar_lea.vmem %s57_s22, 1536  ;;  %p1750_p1 = scmp.lt.s32.totalorder %s57_s22, %s57_s22 }
   0x9   :  { %p1746_p0 = scmp.ne.s32.totalorder %s57_s22, %s1745_s25  ;;  %p1751_p2 = scmp.lt.s32.totalorder %s1745_s25, %s1745_s25 }
   0xb   :  { %p1752_p3 = por %p1751_p2, %p1750_p1 }
   0xd   :  { %p1753_p4 = pnand %p1752_p3, %p1746_p0 }
   0xf   :  { %1756 = shalt.err (!%p1753_p4)
}
  0x10   :  { %s1909_s26 = smov 128   ;;  %s1910_s27 = smov 8  }
  0x11   :  { %62 = dma.hbm_to_vmem [thread:$0]  %s2246_s7, 1536, %s57_s22, [#allocation6], %s1909_s26, %s1909_s26, %s1910_s27  }
  0x12   :  { %s1765_s30 = scalar_lea.vmem %s81_s24, 1536  ;;  %p1770_p6 = scmp.lt.s32.totalorder %s81_s24, %s81_s24 }
  0x13   :  { %p1766_p5 = scmp.ne.s32.totalorder %s81_s24, %s1765_s30  ;;  %p1771_p7 = scmp.lt.s32.totalorder %s1765_s30, %s1765_s30 }
  0x15   :  { %p1772_p8 = por %p1771_p7, %p1770_p6 }
  0x17   :  { %p1773_p9 = pnand %p1772_p8, %p1766_p5 }
  0x19   :  { %1776 = shalt.err (!%p1773_p9)
}
  0x1a   :  { %86 = dma.hbm_to_vmem [thread:$0]  %s2248_s9, 1536, %s81_s24, [#allocation9], %s1909_s26, %s1909_s26, %s1910_s27  }
  0x1b   :  { %s1911_s18 = smov [#allocation11]   ;;  %s1912_s20 = smov [#allocation2]  }
  0x1c   :  { %s106_s19 = sshll.u32 %s1911_s18, 4  ;;  %s40_s21 = sshll.u32 %s1912_s20, 4  ;;  %s107_s19 = int_to_ptr.vmem [resolvable:$true] %s106_s19  ;;  %s41_s21 = int_to_ptr.vmem [resolvable:$true] %s40_s21 }
  0x1d   :  { %s1785_s7 = scalar_lea.vmem %s107_s19, 512  ;;  %p1790_p11 = scmp.lt.s32.totalorder %s107_s19, %s107_s19 }
  0x1e   :  { %p1786_p10 = scmp.ne.s32.totalorder %s107_s19, %s1785_s7  ;;  %p1791_p12 = scmp.lt.s32.totalorder %s1785_s7, %s1785_s7 }
  0x20   :  { %p1792_p13 = por %p1791_p12, %p1790_p11 }
  0x22   :  { %p1793_p0 = pnand %p1792_p13, %p1786_p10 }
  0x24   :  { %1796 = shalt.err (!%p1793_p0)
}
  0x25   :  { %112 = dma.hbm_to_vmem [thread:$0]  %s2251_s12, 512, %s107_s19, [#allocation12], %s1909_s26, %s1909_s26, %s1910_s27  }
  0x26   :  { %s1805_s9 = scalar_lea.vmem %s41_s21, 512  ;;  %p1810_p2 = scmp.lt.s32.totalorder %s41_s21, %s41_s21 }
  0x27   :  { %p1806_p1 = scmp.ne.s32.totalorder %s41_s21, %s1805_s9  ;;  %p1811_p3 = scmp.lt.s32.totalorder %s1805_s9, %s1805_s9 }
  0x29   :  { %p1812_p4 = por %p1811_p3, %p1810_p2 }
  0x2b   :  { %p1813_p5 = pnand %p1812_p4, %p1806_p1 }
  0x2d   :  { %1816 = shalt.err (!%p1813_p5)
}
  0x2e   :  { %46 = dma.hbm_to_vmem [thread:$0]  %s2243_s4, 512, %s41_s21, [#allocation3], %s1909_s26, %s1909_s26, %s1910_s27  }
  0x2f   :  { %s1913_s28 = smov [#allocation7]   ;;  %s1914_s30 = smov [#allocation10]  }
  0x30   :  { %s68_s29 = sshll.u32 %s1913_s28, 4  ;;  %s94_s0 = sshll.u32 %s1914_s30, 4  ;;  %s69_s29 = int_to_ptr.vmem [resolvable:$true] %s68_s29  ;;  %s95_s0 = int_to_ptr.vmem [resolvable:$true] %s94_s0 }
  0x31   :  { %s1825_s12 = scalar_lea.vmem %s69_s29, 1536  ;;  %p1830_p7 = scmp.lt.s32.totalorder %s69_s29, %s69_s29 }
  0x32   :  { %p1826_p6 = scmp.ne.s32.totalorder %s69_s29, %s1825_s12  ;;  %p1831_p8 = scmp.lt.s32.totalorder %s1825_s12, %s1825_s12 }
  0x34   :  { %p1832_p9 = por %p1831_p8, %p1830_p7 }
  0x36   :  { %p1833_p10 = pnand %p1832_p9, %p1826_p6 }
  0x38   :  { %1836 = shalt.err (!%p1833_p10)
}
  0x39   :  { %74 = dma.hbm_to_vmem [thread:$0]  %s2247_s8, 1536, %s69_s29, [#allocation6], %s1909_s26, %s1909_s26, %s1910_s27  }
  0x3a   :  { %s1845_s4 = scalar_lea.vmem %s95_s0, 512  ;;  %p1850_p12 = scmp.lt.s32.totalorder %s95_s0, %s95_s0 }
  0x3b   :  { %p1846_p11 = scmp.ne.s32.totalorder %s95_s0, %s1845_s4  ;;  %p1851_p13 = scmp.lt.s32.totalorder %s1845_s4, %s1845_s4 }
  0x3d   :  { %p1852_p0 = por %p1851_p13, %p1850_p12 }
  0x3f   :  { %p1853_p1 = pnand %p1852_p0, %p1846_p11 }
  0x41   :  { %1856 = shalt.err (!%p1853_p1)
}
  0x42   :  { %100 = dma.hbm_to_vmem [thread:$0]  %s2250_s11, 512, %s95_s0, [#allocation9], %s1909_s26, %s1909_s26, %s1910_s27  }
  0x43   :  { %s1915_s21 = smov [#allocation13]  }
  0x44   :  { %s118_s7 = sshll.u32 %s1915_s21, 4  ;;  %s119_s7 = int_to_ptr.vmem [resolvable:$true] %s118_s7 }
  0x45   :  { %s1865_s22 = scalar_lea.vmem %s119_s7, 512  ;;  %p1870_p3 = scmp.lt.s32.totalorder %s119_s7, %s119_s7 }
  0x46   :  { %p1866_p2 = scmp.ne.s32.totalorder %s119_s7, %s1865_s22  ;;  %p1871_p4 = scmp.lt.s32.totalorder %s1865_s22, %s1865_s22 }
  0x48   :  { %p1872_p5 = por %p1871_p4, %p1870_p3 }
  0x4a   :  { %p1873_p6 = pnand %p1872_p5, %p1866_p2 }
  0x4c   :  { %1876 = shalt.err (!%p1873_p6)
}
  0x4d   :  { %124 = dma.hbm_to_vmem [thread:$0]  %s2252_s13, 512, %s119_s7, [#allocation12], %s1909_s26, %s1909_s26, %s1910_s27  }
  0x4e   :  { %1897 = dma.done.wait [#allocation3], 512  }
  0x4f   :  { %1898 = vsyncadd [#allocation3], 4294966784 }
  0x50   :  { %1899 = dma.done.wait [#allocation6], 3072  }
  0x51   :  { %1900 = vsyncadd [#allocation6], 4294964224 }
  0x52   :  { %1901 = dma.done.wait [#allocation9], 2048  }
  0x53   :  { %1902 = vsyncadd [#allocation9], 4294965248 }
  0x54   :  { %1903 = dma.done.wait [#allocation12], 1024  }
  0x55   :  { %1904 = vsyncadd [#allocation12], 4294966272  ;;  %v1916_v0 = vmov 0.0   ;;  %vm1917_vm0 = vmmov 0   ;;  %v155_v1 = vld [vmem:[%s2242_s3 + $0x18] sm:$0xff]  ;;  %v154_v3 = vld [vmem:[%s2242_s3 + $0x10] sm:$0xff]  ;;  %v319_v14 = vlaneseq }
  0x56   :  { %1545 = vmatprep.subr.mxu0 %v1916_v0  ;;  %1553 = vmatprep.mubr.msk.f32.mxu0 %vm1917_vm0, %v1916_v0  ;;  %v233_v2 = vld [vmem:[#allocation2 + $0x18] sm:$0xff]  ;;  %v232_v4 = vld [vmem:[#allocation2 + $0x10] sm:$0xff]  ;;  %v153_v5 = vld [vmem:[%s2242_s3 + $0x8] sm:$0xff]  ;;  %vm156_vm1 = vcmask 261120   ;;  %v1918_v12 = vmov 1966171168  }
  0x57   :  { %1546 = vmatpush3.msra.mxu0 %v155_v1  ;;  %1556 = vmatprep.subr.mxu1 %v233_v2  ;;  %v231_v6 = vld [vmem:[#allocation2 + $0x8] sm:$0xff]  ;;  %v152_v7 = vld [vmem:[%s2242_s3] sm:$0xff]  ;;  %v317_v13 = vunpack.c.l.s4 %v1918_v12  ;;  %v2093_v16 = vshrl.u32 %v319_v14, 7  ;;  %v379_v41 = vand.u32 127, %v319_v14  ;;  %vm388_vm2 = vcmask 1041409   ;;  %v478_v12 = vld [vmem:[#allocation5 + $0x18] sm:$0xff] }
  0x58   :  { %1547 = vmatprep.subr.mxu0 %v1916_v0  ;;  %1557 = vmatpush3.msra.mxu1 %v233_v2  ;;  %v230_v8 = vld [vmem:[#allocation2] sm:$0xff]  ;;  %v2079_v11 = vld [vmem:[%s2241_s2 + $0x8] sm:$0xff]  ;;  %vm391_vm3 = vcmask 58368   ;;  %v1919_v49 = vmov 0   ;;  %v477_v14 = vld [vmem:[#allocation5 + $0x10] sm:$0xff]  ;;  %s2257_s19 = sld [smem:[#allocation20_spill]] }
  0x59   :  { %1548 = vmatpush3.msra.mxu0 %v154_v3  ;;  %1558 = vmatprep.subr.mxu1 %v232_v4  ;;  %v2068_v9 = vld [vmem:[%s2240_s1] sm:$0x3]  ;;  %v318_v15 = vunpack.c.0.s8 %v317_v13  ;;  %v2097_v20 = vsub.s32 0, %v2093_v16  ;;  %v382_v43 = vsub.s32 %v379_v41, %v2093_v16  ;;  %v2113_v50 = vsub.s32 1, %v2093_v16  ;;  %s1920_s23 = smov [#allocation14]  }
  0x5a   :  { %1549 = vmatprep.subr.mxu0 %v1916_v0  ;;  %1559 = vmatpush3.msra.mxu1 %v232_v4  ;;  %v2074_v10 = vld [vmem:[%s2241_s2] sm:$0xff]  ;;  %vm1430_vm4 = vcmask 254976   ;;  %s1438_s11 = sshll.u32 %s1920_s23, 4  ;;  %s1439_s11 = int_to_ptr.vmem [resolvable:$true] %s1438_s11 }
  0x5b   :  { %1550 = vmatpush3.msra.mxu0 %v153_v5  ;;  %1560 = vmatprep.subr.mxu1 %v231_v6  ;;  %v321_v17 = vsub.s32 %v318_v15, %v2093_v16  ;;  %v1457_v27 = vld [vmem:[%s2244_s5] ss:$0 sm:$0xff]  ;;  %v476_v15 = vld [vmem:[#allocation5 + $0x8] sm:$0xff]  ;;  %s1877_s9 = scalar_lea.vmem %s1439_s11, 32  ;;  %p1882_p8 = scmp.lt.s32.totalorder %s1439_s11, %s1439_s11 }
  0x5c   :  { %1551 = vmatprep.subr.mxu0 %v1916_v0  ;;  %1561 = vmatpush3.msra.mxu1 %v231_v6  ;;  %v1458_v34 = vld [vmem:[%s2245_s6] ss:$0 sm:$0xff]  ;;  %p1878_p7 = scmp.ne.s32.totalorder %s1439_s11, %s1877_s9  ;;  %p1883_p9 = scmp.lt.s32.totalorder %s1877_s9, %s1877_s9 }
  0x5d   :  { %1552 = vmatpush3.msra.mxu0 %v152_v7  ;;  %1562 = vmatprep.subr.mxu1 %v230_v8 }
  0x5e   :  { %1554 = vmatmul.mubr.msk.f32.vlgmr.msra.gmra.mxu0 %vm156_vm1, %v2068_v9  ;;  %1563 = vmatpush3.msra.mxu1 %v230_v8  ;;  %p1884_p10 = por %p1883_p9, %p1882_p8 }
  0x5f   :  { %1564 = vmatprep.mubr.msk.f32.mxu1 %vm156_vm1, %v2074_v10  ;;  %1578 = vmatprep.subr.mxu1 %v1916_v0 }
  0x60   :  { %1565 = vmatmul.mubr.msk.f32.vlgmr.msra.gmra.mxu1 %vm156_vm1, %v2079_v11  ;;  %1567 = vmatprep.subr.mxu0 %v1916_v0  ;;  %p1885_p11 = pnand %p1884_p10, %p1878_p7 }
  0x61   :  { %1586 = vmatprep.mubr.msk.f32.mxu1 %vm1917_vm0, %v1916_v0  ;;  %1575 = vmatprep.mubr.msk.f32.mxu0 %vm1917_vm0, %v1916_v0 }
  0x62   :  { %1714 = vset.pattern.permute.xlu0 %v1919_v49  ;;  %1713 = vset.pattern.permute.xlu1 %v1919_v49  ;;  %v632_v49 = vld [vmem:[#allocation8 + $0x8] sm:$0xff] }
  0x63   :  { %1579 = vmatpush3.msra.mxu1 %v478_v12  ;;  %v1111_v12 = vld [vmem:[#allocation8 + $0x48] sm:$0xff] }
  0x64   :  { %1580 = vmatprep.subr.mxu1 %v1916_v0 }
  0x65   :  { %1581 = vmatpush3.msra.mxu1 %v477_v14 }
  0x66   :  { %1582 = vmatprep.subr.mxu1 %v1916_v0 }
  0x67   :  { %1583 = vmatpush3.msra.mxu1 %v476_v15 }
  0x68   :  { %1584 = vmatprep.subr.mxu1 %v1916_v0 }
 0x11e   :  { %v226_v18 = vpop.f32.mrf.mxu0 }
 0x11f   :  { %v322_v19 = vrot.slane %v226_v18, %v321_v17  ;;  %v482_v18 = vld [vmem:[#allocation7 + $0x18] sm:$0xff] }
 0x120   :  { %v1555_v21 = vpop.f32.mrf.mxu0  ;;  %v1566_v22 = vpop.f32.mrf.mxu1  ;;  %1568 = vmatpush3.msra.mxu0 %v482_v18  ;;  %v1349_v18 = vld [vmem:[#allocation13 + $0x18] sm:$0xff] }
 0x121   :  { %v323_v23 = vcombine.high %v322_v19, %v322_v19  ;;  %v330_v24 = vrot.slane %v322_v19, %v321_v17  ;;  %v2128_v19 = vld [vmem:[%s2257_s19] sm:$0x3]  ;;  %v726_v21 = vld [vmem:[#allocation7 + $0x38] sm:$0xff]  ;;  %1569 = vmatprep.subr.mxu0 %v1916_v0 }
 0x122   :  { %v306_v28 = vpop.f32.mrf.mxu1 }
 0x123   :  { %v337_v25 = vrot.slane %v323_v23, %v321_v17  ;;  %v341_v26 = vrot.slane %v330_v24, %v2097_v20  ;;  %v475_v17 = vld [vmem:[#allocation5] sm:$0xff]  ;;  %v725_v23 = vld [vmem:[#allocation7 + $0x30] sm:$0xff]  ;;  %v480_v24 = vld [vmem:[#allocation7 + $0x8] sm:$0xff] }
 0x124   :  { %1585 = vmatpush3.msra.mxu1 %v475_v17  ;;  %v1198_v17 = vld [vmem:[#allocation10 + $0x18] sm:$0xff] }
 0x125   :  { %v345_v29 = vrot.slane %v337_v25, %v2097_v20  ;;  %v348_v30 = vadd.f32 %v341_v26, %v306_v28  ;;  %1600 = vmatprep.subr.mxu1 %v1916_v0  ;;  %1587 = vmatmul.mubr.msk.f32.vlgmr.msra.gmra.mxu1 %vm156_vm1, %v2128_v19  ;;  %v724_v25 = vld [vmem:[#allocation7 + $0x28] sm:$0xff]  ;;  %v479_v26 = vld [vmem:[#allocation7] sm:$0xff] }
 0x126   :  { %1601 = vmatpush3.msra.mxu1 %v726_v21  ;;  %1608 = vmatprep.mubr.msk.f32.mxu1 %vm1917_vm0, %v1916_v0  ;;  %v1197_v21 = vld [vmem:[#allocation10 + $0x10] sm:$0xff] }
 0x127   :  { %v349_v31 = vadd.f32 %v1566_v22, %v345_v29  ;;  %v357_v32 = vadd.f32 %v1457_v27, %v348_v30  ;;  %v481_v22 = vld [vmem:[#allocation7 + $0x10] sm:$0xff]  ;;  %1602 = vmatprep.subr.mxu1 %v1916_v0 }
 0x128   :  { %1570 = vmatpush3.msra.mxu0 %v481_v22  ;;  %1603 = vmatpush3.msra.mxu1 %v725_v23  ;;  %v1348_v22 = vld [vmem:[#allocation13 + $0x10] sm:$0xff]  ;;  %v1196_v23 = vld [vmem:[#allocation10 + $0x8] sm:$0xff] }
 0x129   :  { %v358_v33 = vadd.f32 %v1457_v27, %v349_v31  ;;  %1715 = vtanh.f32 %v357_v32  ;;  %1571 = vmatprep.subr.mxu0 %v1916_v0  ;;  %1604 = vmatprep.subr.mxu1 %v1916_v0  ;;  %v723_v27 = vld [vmem:[#allocation7 + $0x20] sm:$0xff] }
 0x12a   :  { %1572 = vmatpush3.msra.mxu0 %v480_v24  ;;  %1605 = vmatpush3.msra.mxu1 %v724_v25  ;;  %v1347_v24 = vld [vmem:[#allocation13 + $0x8] sm:$0xff]  ;;  %v1195_v25 = vld [vmem:[#allocation10] sm:$0xff] }
 0x12b   :  { %1717 = vtanh.f32 %v358_v33  ;;  %1573 = vmatprep.subr.mxu0 %v1916_v0  ;;  %1606 = vmatprep.subr.mxu1 %v1916_v0 }
 0x12c   :  { %1574 = vmatpush3.msra.mxu0 %v479_v26  ;;  %1607 = vmatpush3.msra.mxu1 %v723_v27  ;;  %v1346_v26 = vld [vmem:[#allocation13] sm:$0xff] }
 0x12d   :  { %1589 = vmatprep.subr.mxu0 %v1916_v0  ;;  %1622 = vmatprep.subr.mxu1 %v1916_v0 }
 0x136   :  { %v1716_v35 = vpop.eup %1715 }
 0x137   :  { %v368_v36 = vmul.f32 %v1716_v35, %v1458_v34 }
 0x138   :  { %v1718_v37 = vpop.eup %1717 }
 0x139   :  { %v370_v38 = vsel %vm156_vm1, %v368_v36, 0.0  ;;  %v369_v39 = vmul.f32 %v1718_v37, %v1458_v34 }
 0x13a   :  { %371 = vadd.xlane.f32.xlu0 %v370_v38 }
 0x13b   :  { %v373_v40 = vsel %vm156_vm1, %v369_v39, 0.0 }
 0x13e   :  { %374 = vadd.xlane.f32.xlu0 %v373_v40 }
 0x1c3   :  { %v372_v42 = vpop.xlane.xlu0 %371 }
 0x1c4   :  { %v383_v45 = vrot.slane %v372_v42, %v382_v43 }
 0x1c7   :  { %v375_v44 = vpop.xlane.xlu0 %374 }
 0x1c8   :  { %v387_v46 = vrot.slane %v375_v44, %v382_v43 }
 0x1ca   :  { %v389_v47 = vsel %vm388_vm2, %v387_v46, %v383_v45  ;;  %v871_v46 = vld [vmem:[#allocation8 + $0x38] sm:$0xff] }
 0x1cb   :  { %v392_v48 = vsel %vm391_vm3, %v389_v47, -inf }
 0x1cc   :  { %393 = vmax.xlane.f32.xlu1 %v392_v48  ;;  %v870_v48 = vld [vmem:[#allocation8 + $0x30] sm:$0xff] }
 0x1e5   :  { %v627_v14 = vpop.f32.mrf.mxu1 }
 0x1e7   :  { %v1588_v15 = vpop.f32.mrf.mxu1 }
 0x255   :  { %v394_v51 = vpop.xlane.xlu1 %393 }
 0x256   :  { %v399_v52 = vrot.slane %v394_v51, %v2097_v20  ;;  %v403_v53 = vrot.slane %v394_v51, %v2113_v50  ;;  %v869_v51 = vld [vmem:[#allocation8 + $0x28] sm:$0xff] }
 0x258   :  { %v406_v54 = vsub.f32 %v372_v42, %v399_v52  ;;  %v407_v55 = vsub.f32 %v375_v44, %v403_v53  ;;  %v631_v52 = vld [vmem:[#allocation8] sm:$0xff] }
 0x259   :  { %v868_v53 = vld [vmem:[#allocation8 + $0x20] sm:$0xff] }
 0x25a   :  { %v408_v56 = vmul.f32 1.442695, %v406_v54  ;;  %v410_v57 = vmul.f32 1.442695, %v407_v55  ;;  %v721_v54 = vld [vmem:[#allocation5 + $0x38] sm:$0xff] }
 0x25b   :  { %v958_v55 = vld [vmem:[#allocation5 + $0x58] sm:$0xff] }
 0x25c   :  { %1719 = vpow2.f32 %v408_v56  ;;  %v720_v56 = vld [vmem:[#allocation5 + $0x30] sm:$0xff] }
 0x25d   :  { %1721 = vpow2.f32 %v410_v57  ;;  %v957_v57 = vld [vmem:[#allocation5 + $0x50] sm:$0xff] }
 0x269   :  { %v1720_v58 = vpop.eup %1719 }
 0x26a   :  { %v1722_v59 = vpop.eup %1721  ;;  %415 = vperm.xlu1 %1713, %v1720_v58  }
 0x26b   :  { %418 = vperm.xlu0 %1714, %v1722_v59  }
 0x2e5   :  { %v416_v60 = vpop.permute.xlu1 %415 }
 0x2e6   :  { %v419_v61 = vpop.permute.xlu0 %418  ;;  %v423_v62 = vrot.slane %v416_v60, %v382_v43  ;;  %v718_v60 = vld [vmem:[#allocation5 + $0x20] sm:$0xff] }
 0x2e7   :  { %v427_v63 = vrot.slane %v419_v61, %v382_v43  ;;  %v955_v61 = vld [vmem:[#allocation5 + $0x40] sm:$0xff] }
 0x2e9   :  { %v428_v1 = vsel %vm388_vm2, %v427_v63, %v423_v62  ;;  %v963_v62 = vld [vmem:[#allocation7 + $0x58] sm:$0xff] }
 0x2ea   :  { %v430_v2 = vsel %vm391_vm3, %v428_v1, 0.0  ;;  %v1202_v63 = vld [vmem:[#allocation11 + $0x18] sm:$0xff]  ;;  %v962_v1 = vld [vmem:[#allocation7 + $0x50] sm:$0xff] }
 0x2eb   :  { %431 = vadd.xlane.f32.xlu1 %v430_v2  ;;  %v1201_v2 = vld [vmem:[#allocation11 + $0x10] sm:$0xff] }
 0x374   :  { %v432_v3 = vpop.xlane.xlu1 %431 }
 0x375   :  { %v437_v4 = vrot.slane %v432_v3, %v2097_v20  ;;  %v441_v5 = vrot.slane %v432_v3, %v2113_v50  ;;  %v961_v3 = vld [vmem:[#allocation7 + $0x48] sm:$0xff] }
 0x377   :  { %1723 = vrcp.f32 %v437_v4  ;;  %v1200_v4 = vld [vmem:[#allocation11 + $0x8] sm:$0xff] }
 0x378   :  { %1725 = vrcp.f32 %v441_v5  ;;  %v960_v5 = vld [vmem:[#allocation7 + $0x40] sm:$0xff] }
 0x384   :  { %v1724_v6 = vpop.eup %1723 }
 0x385   :  { %v445_v7 = vmul.f32 %v1724_v6, %v1720_v58  ;;  %v1726_v8 = vpop.eup %1725  ;;  %v719_v58 = vld [vmem:[#allocation5 + $0x28] sm:$0xff]  ;;  %v1199_v6 = vld [vmem:[#allocation11] sm:$0xff] }
 0x386   :  { %v447_v13 = vmul.f32 %v1726_v8, %v1722_v59  ;;  %v956_v59 = vld [vmem:[#allocation5 + $0x48] sm:$0xff]  ;;  %v1112_v8 = vld [vmem:[#allocation8 + $0x50] sm:$0xff] }
 0x387   :  { %450 = vperm.xlu0 %1714, %v445_v7   ;;  %v1113_v7 = vld [vmem:[#allocation8 + $0x58] sm:$0xff] }
 0x38b   :  { %455 = vperm.xlu0 %1714, %v447_v13   ;;  %v1110_v13 = vld [vmem:[#allocation8 + $0x40] sm:$0xff] }
 0x402   :  { %v451_v28 = vpop.permute.xlu0 %450 }
 0x403   :  { %v458_v29 = vmul.f32 %v451_v28, %v2074_v10  ;;  %v634_v10 = vld [vmem:[#allocation8 + $0x18] sm:$0xff] }
 0x405   :  { %v460_v30 = vsel %vm156_vm1, %v458_v29, 0.0 }
 0x406   :  { %v461_v31 = vrot.slane %v460_v30, 4  ;;  %v456_v32 = vpop.permute.xlu0 %455 }
 0x407   :  { %v459_v33 = vmul.f32 %v456_v32, %v2079_v11  ;;  %v633_v11 = vld [vmem:[#allocation8 + $0x10] sm:$0xff] }
 0x408   :  { %v462_v34 = vadd.f32 %v461_v31, %v460_v30  ;;  %v474_v31 = vld [vmem:[%s2249_s10] sm:$0xf] }
 0x409   :  { %v467_v35 = vsel %vm156_vm1, %v459_v33, 0.0  ;;  %v709_v33 = vrot.slane %v474_v31, %v2097_v20 }
 0x40a   :  { %v463_v36 = vrot.slane %v462_v34, 2  ;;  %v468_v37 = vrot.slane %v467_v35, 4 }
 0x40c   :  { %v464_v38 = vadd.f32 %v463_v36, %v462_v34  ;;  %v469_v39 = vadd.f32 %v468_v37, %v467_v35 }
 0x40e   :  { %v470_v40 = vrot.slane %v469_v39, 2  ;;  %v465_v41 = vrot.slane %v464_v38, 1 }
 0x410   :  { %v471_v42 = vadd.f32 %v470_v40, %v469_v39  ;;  %v466_v44 = vadd.f32 %v465_v41, %v464_v38  ;;  %v946_v41 = vrot.slane %v474_v31, %v2113_v50 }
 0x412   :  { %v472_v43 = vrot.slane %v471_v42, 1 }
 0x414   :  { %v473_v45 = vadd.f32 %v472_v43, %v471_v42 }
 0x416   :  { %v2147_v47 = vsel %vm388_vm2, %v473_v45, %v466_v44 }
 0x417   :  { %1576 = vmatmul.mubr.msk.f32.vlgmr.msra.gmra.mxu0 %vm156_vm1, %v2147_v47  ;;  %1609 = vmatmul.mubr.msk.f32.vlgmr.msra.gmra.mxu1 %vm156_vm1, %v2147_v47 }
 0x418   :  { %1590 = vmatpush3.msra.mxu0 %v634_v10  ;;  %1623 = vmatpush3.msra.mxu1 %v871_v46 }
 0x419   :  { %1591 = vmatprep.subr.mxu0 %v1916_v0  ;;  %1624 = vmatprep.subr.mxu1 %v1916_v0 }
 0x41a   :  { %1592 = vmatpush3.msra.mxu0 %v633_v11  ;;  %1625 = vmatpush3.msra.mxu1 %v870_v48 }
 0x41b   :  { %1593 = vmatprep.subr.mxu0 %v1916_v0  ;;  %1626 = vmatprep.subr.mxu1 %v1916_v0 }
 0x41c   :  { %1594 = vmatpush3.msra.mxu0 %v632_v49  ;;  %1627 = vmatpush3.msra.mxu1 %v869_v51 }
 0x41d   :  { %1595 = vmatprep.subr.mxu0 %v1916_v0  ;;  %1628 = vmatprep.subr.mxu1 %v1916_v0 }
 0x41e   :  { %1596 = vmatpush3.msra.mxu0 %v631_v52  ;;  %1597 = vmatprep.mubr.msk.f32.mxu0 %vm1917_vm0, %v1916_v0  ;;  %v1116_v52 = vsub.s32 3, %v2093_v16 }
 0x41f   :  { %1629 = vmatpush3.msra.mxu1 %v868_v53  ;;  %1598 = vmatmul.mubr.msk.f32.vlgmr.msra.gmra.mxu0 %vm156_vm1, %v2068_v9  ;;  %v1106_v53 = vsub.s32 2, %v2093_v16 }
 0x420   :  { %1611 = vmatprep.subr.mxu0 %v1916_v0  ;;  %1630 = vmatprep.mubr.msk.f32.mxu1 %vm1917_vm0, %v1916_v0 }
 0x421   :  { %1644 = vmatprep.subr.mxu1 %v1916_v0  ;;  %1612 = vmatpush3.msra.mxu0 %v721_v54  ;;  %v1117_v54 = vrot.slane %v474_v31, %v1116_v52 }
 0x422   :  { %1631 = vmatmul.mubr.msk.f32.vlgmr.msra.gmra.mxu1 %vm156_vm1, %v2068_v9  ;;  %1613 = vmatprep.subr.mxu0 %v1916_v0 }
 0x423   :  { %1645 = vmatpush3.msra.mxu1 %v958_v55  ;;  %1614 = vmatpush3.msra.mxu0 %v720_v56 }
 0x424   :  { %1646 = vmatprep.subr.mxu1 %v1916_v0  ;;  %1615 = vmatprep.subr.mxu0 %v1916_v0 }
 0x425   :  { %1647 = vmatpush3.msra.mxu1 %v957_v57  ;;  %1616 = vmatpush3.msra.mxu0 %v719_v58 }
 0x426   :  { %1648 = vmatprep.subr.mxu1 %v1916_v0  ;;  %1617 = vmatprep.subr.mxu0 %v1916_v0 }
 0x427   :  { %1649 = vmatpush3.msra.mxu1 %v956_v59  ;;  %1618 = vmatpush3.msra.mxu0 %v718_v60  ;;  %v1107_v59 = vrot.slane %v474_v31, %v1106_v53 }
 0x428   :  { %1650 = vmatprep.subr.mxu1 %v1916_v0  ;;  %1619 = vmatprep.mubr.msk.f32.mxu0 %vm1917_vm0, %v1916_v0 }
 0x429   :  { %1651 = vmatpush3.msra.mxu1 %v955_v61  ;;  %1620 = vmatmul.mubr.msk.f32.vlgmr.msra.gmra.mxu0 %vm156_vm1, %v2128_v19 }
 0x42a   :  { %1633 = vmatprep.subr.mxu0 %v1916_v0  ;;  %1652 = vmatprep.mubr.msk.f32.mxu1 %vm1917_vm0, %v1916_v0 }
 0x42b   :  { %1666 = vmatprep.subr.mxu1 %v1916_v0  ;;  %1634 = vmatpush3.msra.mxu0 %v963_v62 }
 0x42c   :  { %1653 = vmatmul.mubr.msk.f32.vlgmr.msra.gmra.mxu1 %vm156_vm1, %v2128_v19  ;;  %1635 = vmatprep.subr.mxu0 %v1916_v0 }
 0x42d   :  { %1667 = vmatpush3.msra.mxu1 %v1202_v63  ;;  %1636 = vmatpush3.msra.mxu0 %v962_v1 }
 0x42e   :  { %1668 = vmatprep.subr.mxu1 %v1916_v0  ;;  %1637 = vmatprep.subr.mxu0 %v1916_v0 }
 0x42f   :  { %1669 = vmatpush3.msra.mxu1 %v1201_v2  ;;  %1638 = vmatpush3.msra.mxu0 %v961_v3 }
 0x430   :  { %1670 = vmatprep.subr.mxu1 %v1916_v0  ;;  %1639 = vmatprep.subr.mxu0 %v1916_v0 }
 0x431   :  { %1671 = vmatpush3.msra.mxu1 %v1200_v4  ;;  %1640 = vmatpush3.msra.mxu0 %v960_v5 }
 0x432   :  { %1672 = vmatprep.subr.mxu1 %v1916_v0  ;;  %1641 = vmatprep.mubr.msk.f32.mxu0 %vm1917_vm0, %v1916_v0 }
 0x433   :  { %1673 = vmatpush3.msra.mxu1 %v1199_v6  ;;  %1674 = vmatprep.mubr.msk.f32.mxu1 %vm1917_vm0, %v1916_v0 }
 0x434   :  { %1642 = vmatmul.mubr.msk.f32.vlgmr.msra.gmra.mxu0 %vm156_vm1, %v2147_v47  ;;  %1675 = vmatmul.mubr.msk.f32.vlgmr.msra.gmra.mxu1 %vm156_vm1, %v2147_v47 }
 0x435   :  { %1655 = vmatprep.subr.mxu0 %v1916_v0  ;;  %1663 = vmatprep.mubr.msk.f32.mxu0 %vm1917_vm0, %v1916_v0 }
 0x436   :  { %1656 = vmatpush3.msra.mxu0 %v1113_v7  ;;  %1688 = vmatprep.subr.mxu1 %v1916_v0 }
 0x437   :  { %1657 = vmatprep.subr.mxu0 %v1916_v0  ;;  %1696 = vmatprep.mubr.msk.f32.mxu1 %vm1917_vm0, %v1916_v0 }
 0x438   :  { %1658 = vmatpush3.msra.mxu0 %v1112_v8  ;;  %1689 = vmatpush3.msra.mxu1 %v1349_v18 }
 0x439   :  { %1659 = vmatprep.subr.mxu0 %v1916_v0  ;;  %1690 = vmatprep.subr.mxu1 %v1916_v0 }
 0x43a   :  { %1660 = vmatpush3.msra.mxu0 %v1111_v12  ;;  %1691 = vmatpush3.msra.mxu1 %v1348_v22 }
 0x43b   :  { %1661 = vmatprep.subr.mxu0 %v1916_v0  ;;  %1692 = vmatprep.subr.mxu1 %v1916_v0 }
 0x43c   :  { %1662 = vmatpush3.msra.mxu0 %v1110_v13  ;;  %1693 = vmatpush3.msra.mxu1 %v1347_v24 }
 0x43d   :  { %1664 = vmatmul.mubr.msk.f32.vlgmr.msra.gmra.mxu0 %vm156_vm1, %v2068_v9  ;;  %1677 = vmatprep.subr.mxu0 %v1916_v0 }
 0x43e   :  { %1685 = vmatprep.mubr.msk.f32.mxu0 %vm1917_vm0, %v1916_v0  ;;  %1678 = vmatpush3.msra.mxu0 %v1198_v17 }
 0x43f   :  { %1679 = vmatprep.subr.mxu0 %v1916_v0  ;;  %1694 = vmatprep.subr.mxu1 %v1916_v0 }
 0x440   :  { %1680 = vmatpush3.msra.mxu0 %v1197_v21  ;;  %1695 = vmatpush3.msra.mxu1 %v1346_v26 }
 0x441   :  { %1681 = vmatprep.subr.mxu0 %v1916_v0  ;;  %1697 = vmatmul.mubr.msk.f32.vlgmr.msra.gmra.mxu1 %vm156_vm1, %v2128_v19 }
 0x442   :  { %1682 = vmatpush3.msra.mxu0 %v1196_v23 }
 0x443   :  { %1683 = vmatprep.subr.mxu0 %v1916_v0 }
 0x444   :  { %1684 = vmatpush3.msra.mxu0 %v1195_v25 }
 0x4d7   :  { %v554_v27 = vpop.f32.mrf.mxu0  ;;  %v793_v28 = vpop.f32.mrf.mxu1 }
 0x4d8   :  { %v628_v32 = vadd.f32 %v627_v14, %v554_v27  ;;  %v1473_v14 = vld [vmem:[%s2253_s14] ss:$0 sm:$0xff] }
 0x4d9   :  { %v1577_v29 = vpop.f32.mrf.mxu0  ;;  %v1610_v30 = vpop.f32.mrf.mxu1 }
 0x4df   :  { %v701_v34 = vpop.f32.mrf.mxu0 }
 0x4e0   :  { %v705_v35 = vadd.f32 %v701_v34, %v628_v32 }
 0x4e1   :  { %v1599_v36 = vpop.f32.mrf.mxu0 }
 0x4e2   :  { %v710_v0 = vadd.f32 %v709_v33, %v705_v35  ;;  %v938_v37 = vpop.f32.mrf.mxu1 }
 0x4e4   :  { %v1462_v38 = vmul.f32 -1.442695, %v710_v0  ;;  %v1632_v39 = vpop.f32.mrf.mxu1 }
 0x4e6   :  { %1727 = vpow2.f32 %v1462_v38 }
 0x4e9   :  { %v863_v19 = vpop.f32.mrf.mxu0 }
 0x4ea   :  { %v864_v40 = vadd.f32 %v863_v19, %v793_v28 }
 0x4eb   :  { %v1621_v42 = vpop.f32.mrf.mxu0 }
 0x4ec   :  { %v942_v43 = vadd.f32 %v938_v37, %v864_v40  ;;  %v1100_v44 = vpop.f32.mrf.mxu1 }
 0x4ee   :  { %v947_v45 = vadd.f32 %v946_v41, %v942_v43  ;;  %v1654_v10 = vpop.f32.mrf.mxu1 }
 0x4f0   :  { %v1466_v46 = vmul.f32 -1.442695, %v947_v45 }
 0x4f2   :  { %1729 = vpow2.f32 %v1466_v46 }
 0x4f3   :  { %v1728_v20 = vpop.eup %1727 }
 0x4f4   :  { %v714_v47 = vadd.f32 1.0, %v1728_v20  ;;  %v1030_v11 = vpop.f32.mrf.mxu0  ;;  %v1269_v48 = vpop.f32.mrf.mxu1 }
 0x4f5   :  { %v1101_v58 = vadd.f32 %v1100_v44, %v1030_v11 }
 0x4f6   :  { %1731 = vrcp.f32 %v714_v47  ;;  %v1643_v49 = vpop.f32.mrf.mxu0  ;;  %v1676_v51 = vpop.f32.mrf.mxu1 }
 0x4f7   :  { %v1108_v62 = vadd.f32 %v1107_v59, %v1101_v58 }
 0x4fd   :  { %v1184_v50 = vpop.f32.mrf.mxu0 }
 0x4fe   :  { %v1185_v60 = vadd.f32 %v1184_v50, %v1117_v54 }
 0x4ff   :  { %v1730_v55 = vpop.eup %1729  ;;  %v1665_v56 = vpop.f32.mrf.mxu0 }
 0x500   :  { %v951_v57 = vadd.f32 1.0, %v1730_v55 }
 0x501   :  { %v1416_v7 = vpop.f32.mrf.mxu1 }
 0x502   :  { %1733 = vrcp.f32 %v951_v57 }
 0x503   :  { %v1732_v61 = vpop.eup %1731  ;;  %v1698_v8 = vpop.f32.mrf.mxu1 }
 0x504   :  { %v1188_v63 = vmul.f32 %v1732_v61, %v1185_v60 }
 0x506   :  { %v1189_v1 = vadd.f32 %v1188_v63, %v1108_v62 }
 0x508   :  { %1735 = vtanh.f32 %v1189_v1 }
 0x50f   :  { %v1734_v2 = vpop.eup %1733 }
 0x510   :  { %v1191_v3 = vsub.f32 1.0, %v1734_v2  ;;  %v1193_v16 = vmul.f32 %v1734_v2, %v2068_v9 }
 0x515   :  { %v1736_v4 = vpop.eup %1735 }
 0x516   :  { %v1192_v5 = vmul.f32 %v1736_v4, %v1191_v3 }
 0x518   :  { %v1194_v6 = vadd.f32 %v1193_v16, %v1192_v5 }
 0x51a   :  { %1686 = vmatmul.mubr.msk.f32.vlgmr.msra.gmra.mxu0 %vm156_vm1, %v1194_v6  ;;  %1431 = vst.msk [vmem:[%s2255_s16] sm:$0x3] %vm1430_vm4, %v1194_v6 }
 0x5da   :  { %v1342_v12 = vpop.f32.mrf.mxu0 }
 0x5db   :  { %v1343_v13 = vadd.f32 %v1342_v12, %v1269_v48 }
 0x5dc   :  { %v1687_v15 = vpop.f32.mrf.mxu0 }
 0x5dd   :  { %v1420_v9 = vadd.f32 %v1416_v7, %v1343_v13 }
 0x5df   :  { %v1428_v17 = vadd.f32 %v1473_v14, %v1420_v9 }
 0x5e1   :  { %1429 = vst [vmem:[#allocation14] sm:$0x3] %v1428_v17 }
 0x5e2   :  { %1888 = shalt.err (!%p1885_p11)
}
 0x5e3   :  { %1441 = dma.vmem_to_hbm [thread:$0]  %s1439_s11, 32, %s2254_s15, [#allocation4]  }
 0x5e4   :  { %1905 = dma.done.wait [#allocation4], 32  }
 0x5e5   :  { %1906 = vsyncadd [#allocation4], 4294967264 }
 0x5e6   :  { %1449 = vsyncpa [#allocation3], 1 }
 0x5e7   :  { %1450 = vsyncpa [#allocation6], 1 }
 0x5e8   :  { %1451 = vsyncpa [#allocation9], 1 }
 0x5e9   :  { %1452 = vsyncpa [#allocation12], 1 }
 0x5ea   :  { %1453 = vsyncpa [#allocation4], 1 }

</bundles_post_ra>
